<compile_context>
chip_gen: v6e
topology: v6e:2x2x1
jax: 0.10.0
libtpu: 0.0.40
codegen_flags: <defaults>
</compile_context>

<pallas_src>
import jax
import jax.numpy as jnp
from jax.experimental import pallas as pl
from jax.experimental.pallas import tpu as pltpu


def _round_up(a, b):
    return (a + b - 1) // b * b


def _input_projection_kernel(x_ref, w_ref, b_ref, o_ref):
    # x_ref: (tm, K)   w_ref: (K, tn)   b_ref: (1, tn)   o_ref: (tm, tn)
    acc = jnp.dot(x_ref[...], w_ref[...], preferred_element_type=jnp.float32)
    o_ref[...] = (acc + b_ref[...].astype(jnp.float32)).astype(o_ref.dtype)


# Conservative per-kernel VMEM budget: leaves ample headroom even on v7x
# (64 MiB physical per TensorCore).
_VMEM_BUDGET = 24 * 1024 * 1024


def input_projection(x, weight, bias):
    """Pallas equivalent of nn.Linear: x[..., K] @ weight[K, N] + bias[N]."""
    *lead, K = x.shape
    Kw, N = weight.shape
    assert K == Kw, (K, Kw)

    M = 1
    for d in lead:
        M *= d
    x2 = x.reshape(M, K)          # free reshape (contiguous)
    b2 = bias.reshape(1, N)

    itemsize = jnp.dtype(x.dtype).itemsize
    # Sublane multiple for the M tile: 8 for f32, 16 for bf16, 32 for int8.
    sub = max(8, 32 // itemsize)

    def footprint(tm, tn):
        # Worst-case double-buffered footprint of all operands (bytes).
        return 2 * (tm * K + tm * tn + K * tn + tn) * itemsize

    tm = min(_round_up(M, sub), 1024)

    if footprint(sub, N) <= _VMEM_BUDGET:
        # Preferred path: keep the whole d_model per tile -> 1-D grid over M,
        # weight/bias blocks have a constant index so they are DMA'd once and
        # stay resident; output stores are maximally lane-dense.
        while tm > sub and footprint(tm, N) > _VMEM_BUDGET:
            tm = max(sub, _round_up(tm // 2, sub))
        tn = N
        grid = (pl.cdiv(M, tm),)
        in_specs = [
            pl.BlockSpec((tm, K), lambda i: (i, 0)),   # activations
            pl.BlockSpec((K, N), lambda i: (0, 0)),    # weight (resident)
            pl.BlockSpec((1, N), lambda i: (0, 0)),    # bias   (resident)
        ]
        out_specs = pl.BlockSpec((tm, N), lambda i: (i, 0))
        dims = ("parallel",)
    else:
        # Fallback for very large d_model: 2-D tiling with N as the OUTER
        # grid axis so the weight/bias block index is constant across the
        # inner (M) sweep -> redundant traffic is (N/tn)*M*K, not (M/tm)*K*N.
        tn = min(2048, _round_up(N, 128))
        while tn > 128 and footprint(sub, tn) > _VMEM_BUDGET:
            tn //= 2
        while tm > sub and footprint(tm, tn) > _VMEM_BUDGET:
            tm = max(sub, _round_up(tm // 2, sub))
        grid = (pl.cdiv(N, tn), pl.cdiv(M, tm))
        in_specs = [
            pl.BlockSpec((tm, K), lambda j, i: (i, 0)),
            pl.BlockSpec((K, tn), lambda j, i: (0, j)),
            pl.BlockSpec((1, tn), lambda j, i: (0, j)),
        ]
        out_specs = pl.BlockSpec((tm, tn), lambda j, i: (i, j))
        dims = ("parallel", "parallel")

    vmem_needed = footprint(tm, tn)
    vmem_limit = int(min(32 * 1024 * 1024, vmem_needed + 4 * 1024 * 1024))

    out = pl.pallas_call(
        _input_projection_kernel,
        out_shape=jax.ShapeDtypeStruct((M, N), x.dtype),
        grid_spec=pltpu.PrefetchScalarGridSpec(
            num_scalar_prefetch=0,
            grid=grid,
            in_specs=in_specs,
            out_specs=out_specs,
        ),
        compiler_params=pltpu.CompilerParams(
            dimension_semantics=dims,
            vmem_limit_bytes=vmem_limit,
        ),
        cost_estimate=pl.CostEstimate(
            flops=2 * M * K * N,
            transcendentals=0,
            bytes_accessed=(M * K + K * N + N + M * N) * itemsize,
        ),
    )(x2, weight, b2)

    return out.reshape(*lead, N)


class Input_Projection:
    """JAX/Pallas counterpart of the PyTorch Input_Projection module."""

    def __init__(self, patch_len, d_model, key=None, dtype=jnp.float32):
        if key is None:
            key = jax.random.PRNGKey(0)
        kw, kb = jax.random.split(key)
        bound = 1.0 / (patch_len ** 0.5)
        # Weight stored pre-transposed as (patch_len, d_model) so the kernel
        # computes x @ W directly (== x @ torch_weight.T).
        self.weight = jax.random.uniform(
            kw, (patch_len, d_model), dtype, minval=-bound, maxval=bound)
        self.bias = jax.random.uniform(
            kb, (d_model,), dtype, minval=-bound, maxval=bound)

    def __call__(self, x):
        return input_projection(x, self.weight, self.bias)


if __name__ == "__main__":
    key = jax.random.PRNGKey(0)
    kx, kp, kx2, kp2, kx3, kp3 = jax.random.split(key, 6)

    # 1) Small shapes consistent with the module's use in a patch-based
    #    transformer: x = [batch, n_patches, patch_len] -> [batch, n_patches, d_model]
    batch, n_patches, patch_len, d_model = 2, 8, 16, 32
    x = jax.random.normal(kx, (batch, n_patches, patch_len), dtype=jnp.float32)
    module = Input_Projection(patch_len, d_model, key=kp)
    y = jax.block_until_ready(module(x))
    ref = jnp.dot(x, module.weight) + module.bias
    assert y.shape == (batch, n_patches, d_model), y.shape
    assert jnp.allclose(y, ref, atol=1e-3, rtol=1e-3), "mismatch vs reference (f32)"

    # 2) Ragged shapes (M not a multiple of the tile, d_model not a multiple
    #    of 128) to exercise Pallas edge-block masking instead of wrapper pad.
    b2_, p2_, pl_, dm_ = 2, 7, 16, 50
    x_r = jax.random.normal(kx2, (b2_, p2_, pl_), dtype=jnp.float32)
    mod_r = Input_Projection(pl_, dm_, key=kp2)
    y_r = jax.block_until_ready(mod_r(x_r))
    ref_r = jnp.dot(x_r, mod_r.weight) + mod_r.bias
    assert y_r.shape == (b2_, p2_, dm_), y_r.shape
    assert jnp.allclose(y_r, ref_r, atol=1e-3, rtol=1e-3), "mismatch vs reference (ragged)"

    # 3) bf16 end-to-end (f32 MXU accumulate, cast on store).
    x_b = jax.random.normal(kx3, (2, 8, 16), dtype=jnp.bfloat16)
    mod_b = Input_Projection(16, 32, key=kp3, dtype=jnp.bfloat16)
    y_b = jax.block_until_ready(mod_b(x_b))
    ref_b = (jnp.dot(x_b.astype(jnp.float32), mod_b.weight.astype(jnp.float32))
             + mod_b.bias.astype(jnp.float32))
    assert y_b.dtype == jnp.bfloat16
    assert jnp.allclose(y_b.astype(jnp.float32), ref_b, atol=1e-1, rtol=1e-1), \
        "mismatch vs reference (bf16)"

    print("KERNEL_OK")
</pallas_src>

<mosaic_0001>
module attributes {stable_mosaic.version = 11 : i64} {
  func.func @_input_projection_kernel(%arg0: i32, %arg1: memref<16x16xf32, #tpu.memory_space<vmem>>, %arg2: memref<16x32xf32, #tpu.memory_space<vmem>>, %arg3: memref<1x32xf32, #tpu.memory_space<vmem>>, %arg4: memref<16x32xf32, #tpu.memory_space<vmem>>) attributes {dimension_semantics = [#tpu.dimension_semantics<parallel>], iteration_bounds = array<i64: 1>, scalar_prefetch = 0 : i64, scratch_operands = 0 : i64, tpu.core_type = #tpu.core_type<tc>, window_params = [{transform_indices = @transform_0, window_bounds = array<i64: 16, 16>}, {pipeline_mode = #tpu.pipeline_mode<synchronous>, transform_indices = @transform_1, window_bounds = array<i64: 16, 32>}, {pipeline_mode = #tpu.pipeline_mode<synchronous>, transform_indices = @transform_2, window_bounds = array<i64: 1, 32>}, {transform_indices = @transform_3, window_bounds = array<i64: 16, 32>}]} {
    %c0 = arith.constant 0 : index
    %c0_0 = arith.constant 0 : index
    %0 = vector.load %arg1[%c0, %c0_0] : memref<16x16xf32, #tpu.memory_space<vmem>>, vector<16x16xf32>
    %c0_1 = arith.constant 0 : index
    %c0_2 = arith.constant 0 : index
    %1 = vector.load %arg2[%c0_1, %c0_2] : memref<16x32xf32, #tpu.memory_space<vmem>>, vector<16x32xf32>
    %cst = arith.constant dense<0.000000e+00> : vector<16x32xf32>
    %2 = tpu.matmul %0, %1, %cst {dimension_numbers = #tpu.dot_dimension_numbers<[1], [0], [0], [1], [0, 0, 1, 1], [], []>} : vector<16x16xf32>, vector<16x32xf32>, vector<16x32xf32> -> vector<16x32xf32>
    %c0_3 = arith.constant 0 : index
    %c0_4 = arith.constant 0 : index
    %3 = vector.load %arg3[%c0_3, %c0_4] : memref<1x32xf32, #tpu.memory_space<vmem>>, vector<1x32xf32>
    %4 = vector.broadcast %3 : vector<1x32xf32> to vector<16x32xf32>
    %5 = arith.addf %2, %4 : vector<16x32xf32>
    %c0_5 = arith.constant 0 : index
    %c0_6 = arith.constant 0 : index
    %6 = vector.load %arg4[%c0_5, %c0_6] : memref<16x32xf32, #tpu.memory_space<vmem>>, vector<16x32xf32>
    tpu.vector_store %arg4[%c0_5, %c0_6], %5 {strides = array<i32>} : memref<16x32xf32, #tpu.memory_space<vmem>>, vector<16x32xf32>,
    return
  }
  func.func @transform_0(%arg0: i32) -> (i32, i32) {
    %c0_i32 = arith.constant 0 : i32
    %c0_i32_0 = arith.constant 0 : i32
    return %arg0, %c0_i32 : i32, i32
  }
  func.func @transform_1(%arg0: i32) -> (i32, i32) {
    %c0_i32 = arith.constant 0 : i32
    %c0_i32_0 = arith.constant 0 : i32
    %c0_i32_1 = arith.constant 0 : i32
    return %c0_i32, %c0_i32_0 : i32, i32
  }
  func.func @transform_2(%arg0: i32) -> (i32, i32) {
    %c0_i32 = arith.constant 0 : i32
    %c0_i32_0 = arith.constant 0 : i32
    %c0_i32_1 = arith.constant 0 : i32
    return %c0_i32, %c0_i32_0 : i32, i32
  }
  func.func @transform_3(%arg0: i32) -> (i32, i32) {
    %c0_i32 = arith.constant 0 : i32
    %c0_i32_0 = arith.constant 0 : i32
    return %arg0, %c0_i32 : i32, i32
  }
}

</mosaic_0001>

<bundles_post_ra>
// kernel: tpu_custom_call.1
= control target key start
LH: loop header
LB: loop body
LE: loop exit
PB: predicated region body
PF: predicated region fallthrough
CT: control target
= control target key end

     0   :  { %8 = vsyncpa [#allocation3], 0  ;;  %s288_s0 = inlined_call_operand.hbm [shape: f32[16,16], index: 0, kind: input, shape index: {}]   ;;  %s289_s1 = inlined_call_operand.hbm [shape: f32[16,32], index: 1, kind: input, shape index: {}]   ;;  %s290_s2 = inlined_call_operand.vmem [shape: f32[1,32], index: 2, kind: input, shape index: {}]   ;;  %s291_s3 = inlined_call_operand.hbm [shape: f32[16,32], index: 3, kind: output, shape index: {}]  }
   0x1   :  { %9 = vsyncpa [#allocation6], 0 }
   0x2   :  { %10 = vsyncpa [#allocation4], 0  ;;  %s242_s12 = smov [#allocation2]  }
   0x3   :  { %s16_s13 = sshll.u32 %s242_s12, 4  ;;  %s17_s13 = int_to_ptr.vmem [resolvable:$true] %s16_s13 }
   0x4   :  { %s184_s14 = scalar_lea.vmem %s17_s13, 256  ;;  %p189_p1 = scmp.lt.s32.totalorder %s17_s13, %s17_s13 }
   0x5   :  { %p185_p0 = scmp.ne.s32.totalorder %s17_s13, %s184_s14  ;;  %p190_p2 = scmp.lt.s32.totalorder %s184_s14, %s184_s14 }
   0x7   :  { %p191_p3 = por %p190_p2, %p189_p1 }
   0x9   :  { %p192_p4 = pnand %p191_p3, %p185_p0 }
   0xb   :  { %195 = shalt.err (!%p192_p4)
}
   0xc   :  { %s243_s15 = smov 128   ;;  %s244_s16 = smov 8  }
   0xd   :  { %22 = dma.hbm_to_vmem [thread:$0]  %s288_s0, 256, %s17_s13, [#allocation3], %s243_s15, %s243_s15, %s244_s16  }
   0xe   :  { %s245_s19 = smov [#allocation5]  }
   0xf   :  { %s28_s20 = sshll.u32 %s245_s19, 4  ;;  %s29_s20 = int_to_ptr.vmem [resolvable:$true] %s28_s20 }
  0x10   :  { %s204_s21 = scalar_lea.vmem %s29_s20, 256  ;;  %p209_p6 = scmp.lt.s32.totalorder %s29_s20, %s29_s20 }
  0x11   :  { %p205_p5 = scmp.ne.s32.totalorder %s29_s20, %s204_s21  ;;  %p210_p7 = scmp.lt.s32.totalorder %s204_s21, %s204_s21 }
  0x13   :  { %p211_p8 = por %p210_p7, %p209_p6 }
  0x15   :  { %p212_p9 = pnand %p211_p8, %p205_p5 }
  0x17   :  { %215 = shalt.err (!%p212_p9)
}
  0x18   :  { %34 = dma.hbm_to_vmem [thread:$0]  %s289_s1, 256, %s29_s20, [#allocation6], %s243_s15, %s243_s15, %s244_s16  }
  0x19   :  { %236 = dma.done.wait [#allocation3], 256  }
  0x1a   :  { %237 = vsyncadd [#allocation3], 4294967040 }
  0x1b   :  { %238 = dma.done.wait [#allocation6], 256  }
  0x1c   :  { %239 = vsyncadd [#allocation6], 4294967040  ;;  %vm54_vm0 = vcmask 130048   ;;  %v46_v0 = vld [vmem:[#allocation5 + $0x8] sm:$0xff]  ;;  %v45_v1 = vld [vmem:[#allocation5] sm:$0xff]  ;;  %vm136_vm1 = vcmask 261120  }
  0x1d   :  { %v43_v2 = vld [vmem:[#allocation2] sm:$0xff]  ;;  %164 = vmatprep.subr.mxu0 %v46_v0  ;;  %v44_v3 = vld [vmem:[#allocation2 + $0x8] sm:$0xff]  ;;  %s246_s1 = smov [#allocation7]  }
  0x1e   :  { %168 = vmatprep.mubr.msk.f32.mxu0 %vm54_vm0, %v43_v2  ;;  %165 = vmatpush3.msra.mxu0 %v46_v0  ;;  %v157_v4 = vld [vmem:[%s290_s2] ss:$0 sm:$0xff]  ;;  %s144_s25 = sshll.u32 %s246_s1, 4  ;;  %s145_s25 = int_to_ptr.vmem [resolvable:$true] %s144_s25 }
  0x1f   :  { %166 = vmatprep.subr.mxu0 %v45_v1  ;;  %s216_s26 = scalar_lea.vmem %s145_s25, 256  ;;  %p221_p11 = scmp.lt.s32.totalorder %s145_s25, %s145_s25 }
  0x20   :  { %167 = vmatpush3.msra.mxu0 %v45_v1  ;;  %p217_p10 = scmp.ne.s32.totalorder %s145_s25, %s216_s26  ;;  %p222_p12 = scmp.lt.s32.totalorder %s216_s26, %s216_s26 }
  0x21   :  { %169 = vmatmul.mubr.msk.f32.vlgmr.msra.gmra.mxu0 %vm54_vm0, %v44_v3 }
  0x22   :  { %p223_p13 = por %p222_p12, %p221_p11 }
  0x24   :  { %p224_p0 = pnand %p223_p13, %p217_p10 }
  0xe1   :  { %v170_v5 = vpop.f32.mrf.mxu0 }
  0xe2   :  { %v133_v6 = vadd.f32 %v170_v5, %v157_v4 }
  0xe3   :  { %v127_v7 = vpop.f32.mrf.mxu0 }
  0xe4   :  { %v128_v8 = vadd.f32 %v157_v4, %v127_v7  ;;  %138 = vst.msk [vmem:[#allocation7 + $0x8] sm:$0xff] %vm136_vm1, %v133_v6 }
  0xe6   :  { %137 = vst.msk [vmem:[#allocation7] sm:$0xff] %vm136_vm1, %v128_v8 }
  0xe7   :  { %227 = shalt.err (!%p224_p0)
}
  0xe8   :  { %150 = dma.vmem_to_hbm [thread:$0]  %s145_s25, 256, %s291_s3, [#allocation4], %s243_s15, %s243_s15, %s244_s16  }
  0xe9   :  { %240 = dma.done.wait [#allocation4], 256  }
  0xea   :  { %241 = vsyncadd [#allocation4], 4294967040 }
  0xeb   :  { %154 = vsyncpa [#allocation3], 1 }
  0xec   :  { %155 = vsyncpa [#allocation6], 1 }
  0xed   :  { %156 = vsyncpa [#allocation4], 1 }

</bundles_post_ra>
